<compile_context>
chip_gen: v7x
topology: tpu7x:2x2x1
jax: 0.10.0
libtpu: 0.0.40
codegen_flags: <defaults>
</compile_context>

<pallas_src>
import math

import jax
import jax.numpy as jnp
from jax.experimental import pallas as pl
from jax.experimental.pallas import tpu as pltpu


def _round_up(x, m):
    return (x + m - 1) // m * m


def _xavier_uniform(key, fan_in, fan_out, dtype=jnp.float32):
    """torch.nn.init.xavier_uniform_ equivalent; returns (fan_in, fan_out)."""
    bound = math.sqrt(6.0 / (fan_in + fan_out))
    return jax.random.uniform(
        key, (fan_in, fan_out), dtype=dtype, minval=-bound, maxval=bound
    )


def _accdoa_kernel(x_ref, w1_ref, b1_ref, w2_ref, b2_ref, o_ref):
    # In-kernel cast of the dominant x stream (f32 -> bf16) for the MXU.
    xb = x_ref[...].astype(w1_ref.dtype)
    # h = x @ W1 + b1   (bf16 x bf16 -> f32 accumulate, bias-add in f32)
    h = (
        jnp.dot(xb, w1_ref[...], preferred_element_type=jnp.float32)
        + b1_ref[...]
    )
    # y = h @ W2 + b2 ; out = tanh(y).  h cast once to bf16, no scratch
    # round-trip; bias-add + tanh stay in f32 (safe on v5e: no bf16 VPU/EUP).
    y = (
        jnp.dot(h.astype(w2_ref.dtype), w2_ref[...],
                preferred_element_type=jnp.float32)
        + b2_ref[...]
    )
    o_ref[...] = jnp.tanh(y).astype(o_ref.dtype)


def accdoa_head_forward(x, w1, b1, w2, b2, *, row_tile=512,
                        compute_dtype=jnp.bfloat16):
    """x: (B, T, C) -> (B, T, 3 * nb_classes)."""
    B, T, C = x.shape
    ffn_dim = w1.shape[1]
    out_dim = w2.shape[1]
    rows = B * T

    # Row tile: large (amortizes ~0.35us/step), 16-sublane aligned for bf16
    # vreg packing.  If the whole problem fits in one tile, use exactly the
    # row count (block == full dim waives the 8-divisibility constraint).
    if rows <= row_tile:
        row_tile = rows
        grid_rows = 1
    else:
        row_tile = max(16, _round_up(row_tile, 16))
        grid_rows = pl.cdiv(rows, row_tile)   # partial last tile is masked

    # Lane-dense output: pad 3*nb_classes up to a multiple of 128 so stores
    # are unmasked full-lane vst (W2/b2 columns zero-padded once, tiny).
    out_pad = _round_up(out_dim, 128)

    x2d = x.reshape(rows, C)                    # metadata-only reshape, f32

    w1c = w1.astype(compute_dtype)
    w2c = w2.astype(compute_dtype)
    b2f = b2.astype(jnp.float32)
    if out_pad != out_dim:
        w2c = jnp.pad(w2c, ((0, 0), (0, out_pad - out_dim)))
        b2f = jnp.pad(b2f, (0, out_pad - out_dim))
    b1_2d = b1.astype(jnp.float32).reshape(1, ffn_dim)
    b2_2d = b2f.reshape(1, out_pad)

    cdt = jnp.dtype(compute_dtype).itemsize
    cost = pl.CostEstimate(
        flops=2 * rows * (C * ffn_dim + ffn_dim * out_pad),
        transcendentals=rows * out_pad,
        bytes_accessed=(
            rows * C * x.dtype.itemsize                 # x stream (f32 read)
            + (C * ffn_dim + ffn_dim * out_pad) * cdt   # weights (one-time)
            + (ffn_dim + out_pad) * 4                   # biases (f32)
            + rows * out_pad * cdt                      # output slab (bf16)
        ),
    )

    out2d = pl.pallas_call(
        _accdoa_kernel,
        out_shape=jax.ShapeDtypeStruct((rows, out_pad), compute_dtype),
        grid_spec=pltpu.PrefetchScalarGridSpec(
            num_scalar_prefetch=0,
            grid=(grid_rows,),
            in_specs=[
                pl.BlockSpec((row_tile, C), lambda i: (i, 0)),
                pl.BlockSpec((C, ffn_dim), lambda i: (0, 0)),
                pl.BlockSpec((1, ffn_dim), lambda i: (0, 0)),
                pl.BlockSpec((ffn_dim, out_pad), lambda i: (0, 0)),
                pl.BlockSpec((1, out_pad), lambda i: (0, 0)),
            ],
            out_specs=pl.BlockSpec((row_tile, out_pad), lambda i: (i, 0)),
        ),
        compiler_params=pltpu.CompilerParams(
            dimension_semantics=("parallel",),
        ),
        cost_estimate=cost,
    )(x2d, w1c, b1_2d, w2c, b2_2d)

    # Tiny post-pass: slice off the lane padding and restore the input dtype.
    return out2d[:, :out_dim].astype(x.dtype).reshape(B, T, out_dim)


def init_accdoa_params(key, enc_out_dim, ffn_dim, nb_classes):
    """Deterministic param init matching ACCDOAhead.__init__ / init_head."""
    k1, k2 = jax.random.split(key)
    out_dim = 3 * nb_classes
    w1 = _xavier_uniform(k1, enc_out_dim, ffn_dim)   # (C, ffn_dim)
    b1 = jnp.zeros((ffn_dim,), jnp.float32)
    w2 = _xavier_uniform(k2, ffn_dim, out_dim)       # (ffn_dim, 3*nb_classes)
    b2 = jnp.zeros((out_dim,), jnp.float32)
    return w1, b1, w2, b2


if __name__ == "__main__":
    # Small shapes consistent with the module's (B, T, C) forward.
    B, T = 2, 8
    enc_out_dim, ffn_dim, nb_classes = 32, 64, 4

    key = jax.random.PRNGKey(0)
    kx, kp = jax.random.split(key)

    x = jax.random.normal(kx, (B, T, enc_out_dim), dtype=jnp.float32)
    w1, b1, w2, b2 = init_accdoa_params(kp, enc_out_dim, ffn_dim, nb_classes)

    out = accdoa_head_forward(x, w1, b1, w2, b2)
    out = jax.block_until_ready(out)
    assert out.shape == (B, T, 3 * nb_classes)
    assert out.dtype == x.dtype

    # Reference in plain JAX using the same bf16-operand / f32-accumulate /
    # bf16-store path as the kernel.
    xb = x.reshape(B * T, -1).astype(jnp.bfloat16)
    h_ref = jnp.dot(xb, w1.astype(jnp.bfloat16),
                    preferred_element_type=jnp.float32) + b1
    y_ref = jnp.dot(h_ref.astype(jnp.bfloat16), w2.astype(jnp.bfloat16),
                    preferred_element_type=jnp.float32) + b2
    ref = (jnp.tanh(y_ref).astype(jnp.bfloat16).astype(jnp.float32)
           .reshape(B, T, 3 * nb_classes))
    max_err = float(jnp.max(jnp.abs(out - ref)))
    assert jnp.allclose(out, ref, atol=5e-3, rtol=5e-3), max_err

    print("KERNEL_OK")
</pallas_src>

<mosaic_0001>
module attributes {stable_mosaic.version = 11 : i64} {
  func.func @_accdoa_kernel(%arg0: i32, %arg1: memref<16x32xf32, #tpu.memory_space<vmem>>, %arg2: memref<32x64xbf16, #tpu.memory_space<vmem>>, %arg3: memref<1x64xf32, #tpu.memory_space<vmem>>, %arg4: memref<64x128xbf16, #tpu.memory_space<vmem>>, %arg5: memref<1x128xf32, #tpu.memory_space<vmem>>, %arg6: memref<16x128xbf16, #tpu.memory_space<vmem>>) attributes {dimension_semantics = [#tpu.dimension_semantics<parallel>], iteration_bounds = array<i64: 1>, scalar_prefetch = 0 : i64, scratch_operands = 0 : i64, tpu.core_type = #tpu.core_type<tc>, window_params = [{transform_indices = @transform_0, window_bounds = array<i64: 16, 32>}, {pipeline_mode = #tpu.pipeline_mode<synchronous>, transform_indices = @transform_1, window_bounds = array<i64: 32, 64>}, {pipeline_mode = #tpu.pipeline_mode<synchronous>, transform_indices = @transform_2, window_bounds = array<i64: 1, 64>}, {pipeline_mode = #tpu.pipeline_mode<synchronous>, transform_indices = @transform_3, window_bounds = array<i64: 64, 128>}, {pipeline_mode = #tpu.pipeline_mode<synchronous>, transform_indices = @transform_4, window_bounds = array<i64: 1, 128>}, {transform_indices = @transform_5, window_bounds = array<i64: 16, 128>}]} {
    %c0 = arith.constant 0 : index
    %c0_0 = arith.constant 0 : index
    %0 = vector.load %arg1[%c0, %c0_0] : memref<16x32xf32, #tpu.memory_space<vmem>>, vector<16x32xf32>
    %1 = arith.truncf %0 : vector<16x32xf32> to vector<16x32xbf16>
    %c0_1 = arith.constant 0 : index
    %c0_2 = arith.constant 0 : index
    %2 = vector.load %arg2[%c0_1, %c0_2] : memref<32x64xbf16, #tpu.memory_space<vmem>>, vector<32x64xbf16>
    %cst = arith.constant dense<0.000000e+00> : vector<16x64xf32>
    %3 = tpu.matmul %1, %2, %cst {dimension_numbers = #tpu.dot_dimension_numbers<[1], [0], [0], [1], [0, 0, 1, 1], [], []>} : vector<16x32xbf16>, vector<32x64xbf16>, vector<16x64xf32> -> vector<16x64xf32>
    %c0_3 = arith.constant 0 : index
    %c0_4 = arith.constant 0 : index
    %4 = vector.load %arg3[%c0_3, %c0_4] : memref<1x64xf32, #tpu.memory_space<vmem>>, vector<1x64xf32>
    %5 = vector.broadcast %4 : vector<1x64xf32> to vector<16x64xf32>
    %6 = arith.addf %3, %5 : vector<16x64xf32>
    %7 = arith.truncf %6 : vector<16x64xf32> to vector<16x64xbf16>
    %c0_5 = arith.constant 0 : index
    %c0_6 = arith.constant 0 : index
    %8 = vector.load %arg4[%c0_5, %c0_6] : memref<64x128xbf16, #tpu.memory_space<vmem>>, vector<64x128xbf16>
    %cst_7 = arith.constant dense<0.000000e+00> : vector<16x128xf32>
    %9 = tpu.matmul %7, %8, %cst_7 {dimension_numbers = #tpu.dot_dimension_numbers<[1], [0], [0], [1], [0, 0, 1, 1], [], []>} : vector<16x64xbf16>, vector<64x128xbf16>, vector<16x128xf32> -> vector<16x128xf32>
    %c0_8 = arith.constant 0 : index
    %c0_9 = arith.constant 0 : index
    %10 = vector.load %arg5[%c0_8, %c0_9] : memref<1x128xf32, #tpu.memory_space<vmem>>, vector<1x128xf32>
    %11 = vector.broadcast %10 : vector<1x128xf32> to vector<16x128xf32>
    %12 = arith.addf %9, %11 : vector<16x128xf32>
    %13 = math.tanh %12 : vector<16x128xf32>
    %14 = arith.truncf %13 : vector<16x128xf32> to vector<16x128xbf16>
    %c0_10 = arith.constant 0 : index
    %c0_11 = arith.constant 0 : index
    %15 = vector.load %arg6[%c0_10, %c0_11] : memref<16x128xbf16, #tpu.memory_space<vmem>>, vector<16x128xbf16>
    tpu.vector_store %arg6[%c0_10, %c0_11], %14 {strides = array<i32>} : memref<16x128xbf16, #tpu.memory_space<vmem>>, vector<16x128xbf16>,
    return
  }
  func.func @transform_0(%arg0: i32) -> (i32, i32) {
    %c0_i32 = arith.constant 0 : i32
    %c0_i32_0 = arith.constant 0 : i32
    return %arg0, %c0_i32 : i32, i32
  }
  func.func @transform_1(%arg0: i32) -> (i32, i32) {
    %c0_i32 = arith.constant 0 : i32
    %c0_i32_0 = arith.constant 0 : i32
    %c0_i32_1 = arith.constant 0 : i32
    return %c0_i32, %c0_i32_0 : i32, i32
  }
  func.func @transform_2(%arg0: i32) -> (i32, i32) {
    %c0_i32 = arith.constant 0 : i32
    %c0_i32_0 = arith.constant 0 : i32
    %c0_i32_1 = arith.constant 0 : i32
    return %c0_i32, %c0_i32_0 : i32, i32
  }
  func.func @transform_3(%arg0: i32) -> (i32, i32) {
    %c0_i32 = arith.constant 0 : i32
    %c0_i32_0 = arith.constant 0 : i32
    %c0_i32_1 = arith.constant 0 : i32
    return %c0_i32, %c0_i32_0 : i32, i32
  }
  func.func @transform_4(%arg0: i32) -> (i32, i32) {
    %c0_i32 = arith.constant 0 : i32
    %c0_i32_0 = arith.constant 0 : i32
    %c0_i32_1 = arith.constant 0 : i32
    return %c0_i32, %c0_i32_0 : i32, i32
  }
  func.func @transform_5(%arg0: i32) -> (i32, i32) {
    %c0_i32 = arith.constant 0 : i32
    %c0_i32_0 = arith.constant 0 : i32
    return %arg0, %c0_i32 : i32, i32
  }
}

</mosaic_0001>

<bundles_post_ra>
// kernel: tpu_custom_call.1
= control target key start
LH: loop header
LB: loop body
LE: loop exit
PB: predicated region body
PF: predicated region fallthrough
CT: control target
= control target key end

     0   :  { %10 = vsyncpa [#allocation3], 0  ;;  %s513_s0 = inlined_call_operand.hbm [shape: f32[16,32], index: 0, kind: input, shape index: {}]   ;;  %s514_s1 = inlined_call_operand.hbm [shape: bf16[32,64], index: 1, kind: input, shape index: {}]   ;;  %s515_s2 = inlined_call_operand.vmem [shape: f32[1,64], index: 2, kind: input, shape index: {}]   ;;  %s516_s3 = inlined_call_operand.hbm [shape: bf16[64,128], index: 3, kind: input, shape index: {}]   ;;  %s517_s4 = inlined_call_operand.vmem [shape: f32[1,128], index: 4, kind: input, shape index: {}]   ;;  %s518_s5 = inlined_call_operand.hbm [shape: bf16[16,128], index: 5, kind: output, shape index: {}]  }
   0x1   :  { %11 = vsyncpa [#allocation6], 0 }
   0x2   :  { %12 = vsyncpa [#allocation4], 0  ;;  %s410_s18 = smov [#allocation5]   ;;  %s316_s22 = scalar_lea.hbm %s514_s1, 256 }
   0x3   :  { %s30_s19 = sshll.u32 %s410_s18, 4  ;;  %p317_p0 = scmp.ne.s32.totalorder %s514_s1, %s316_s22  ;;  %s31_s19 = int_to_ptr.vmem [resolvable:$true] %s30_s19 }
   0x4   :  { %p320_p1 = scmp.lt.u32.totalorder %s316_s22, %s514_s1 }
   0x6   :  { %p322_p2 = pnand %p320_p1, %p317_p0 }
   0x8   :  { %325 = shalt.err (!%p322_p2)
}
   0x9   :  { %s326_s27 = scalar_lea.vmem %s31_s19, 256  ;;  %p331_p4 = scmp.lt.s32.totalorder %s31_s19, %s31_s19 }
   0xa   :  { %p327_p3 = scmp.ne.s32.totalorder %s31_s19, %s326_s27  ;;  %p332_p5 = scmp.lt.s32.totalorder %s326_s27, %s326_s27 }
   0xc   :  { %p333_p6 = por %p332_p5, %p331_p4 }
   0xe   :  { %p334_p7 = pnand %p333_p6, %p327_p3 }
  0x10   :  { %337 = shalt.err (!%p334_p7)
}
  0x11   :  { %s411_s28 = smov 64   ;;  %s412_s29 = smov 4  }
  0x12   :  { %36 = dma.hbm_to_vmem [thread:$0]  %s514_s1, 256, %s31_s19, [#allocation6], %s411_s28, %s411_s28, %s412_s29  }
  0x13   :  { %s413_s7 = smov [#allocation2]   ;;  %s338_s11 = scalar_lea.hbm %s513_s0, 256 }
  0x14   :  { %s18_s8 = sshll.u32 %s413_s7, 4  ;;  %p339_p8 = scmp.ne.s32.totalorder %s513_s0, %s338_s11  ;;  %s19_s8 = int_to_ptr.vmem [resolvable:$true] %s18_s8 }
  0x15   :  { %p342_p9 = scmp.lt.u32.totalorder %s338_s11, %s513_s0 }
  0x17   :  { %p344_p10 = pnand %p342_p9, %p339_p8 }
  0x19   :  { %347 = shalt.err (!%p344_p10)
}
  0x1a   :  { %s348_s16 = scalar_lea.vmem %s19_s8, 256  ;;  %p353_p12 = scmp.lt.s32.totalorder %s19_s8, %s19_s8 }
  0x1b   :  { %p349_p11 = scmp.ne.s32.totalorder %s19_s8, %s348_s16  ;;  %p354_p13 = scmp.lt.s32.totalorder %s348_s16, %s348_s16 }
  0x1d   :  { %p355_p0 = por %p354_p13, %p353_p12 }
  0x1f   :  { %p356_p1 = pnand %p355_p0, %p349_p11 }
  0x21   :  { %359 = shalt.err (!%p356_p1)
}
  0x22   :  { %s414_s1 = smov 128   ;;  %s415_s17 = smov 8  }
  0x23   :  { %24 = dma.hbm_to_vmem [thread:$0]  %s513_s0, 256, %s19_s8, [#allocation3], %s414_s1, %s414_s1, %s415_s17  }
  0x24   :  { %s416_s20 = smov [#allocation7]   ;;  %s360_s24 = scalar_lea.hbm %s516_s3, 512 }
  0x25   :  { %s44_s21 = sshll.u32 %s416_s20, 4  ;;  %p361_p2 = scmp.ne.s32.totalorder %s516_s3, %s360_s24  ;;  %s45_s21 = int_to_ptr.vmem [resolvable:$true] %s44_s21 }
  0x26   :  { %p364_p3 = scmp.lt.u32.totalorder %s360_s24, %s516_s3 }
  0x28   :  { %p366_p4 = pnand %p364_p3, %p361_p2 }
  0x2a   :  { %369 = shalt.err (!%p366_p4)
}
  0x2b   :  { %s370_s6 = scalar_lea.vmem %s45_s21, 512  ;;  %p375_p6 = scmp.lt.s32.totalorder %s45_s21, %s45_s21 }
  0x2c   :  { %p371_p5 = scmp.ne.s32.totalorder %s45_s21, %s370_s6  ;;  %p376_p7 = scmp.lt.s32.totalorder %s370_s6, %s370_s6 }
  0x2e   :  { %p377_p8 = por %p376_p7, %p375_p6 }
  0x30   :  { %p378_p9 = pnand %p377_p8, %p371_p5 }
  0x32   :  { %381 = shalt.err (!%p378_p9)
}
  0x33   :  { %50 = dma.hbm_to_vmem [thread:$0]  %s516_s3, 512, %s45_s21, [#allocation6], %s411_s28, %s411_s28, %s412_s29  }
  0x34   :  { %404 = dma.done.wait [#allocation3], 256  }
  0x35   :  { %405 = vsyncadd [#allocation3], 4294967040 }
  0x36   :  { %406 = dma.done.wait [#allocation6], 768  }
  0x37   :  { %407 = vsyncadd [#allocation6], 4294966528  ;;  %v417_v0 = vmov 0.0   ;;  %vm418_vm0 = vmmov 0   ;;  %v306_v1 = vld [vmem:[#allocation5] sm:$0xff]   ;;  %v307_v2 = vld [vmem:[#allocation5 + $0x8] sm:$0xff]  }
  0x38   :  { %276 = vmatprep.subr.bf16.mxu0 %v417_v0  ;;  %280 = vmatprep.mubr.msk.bf16.mxu0 %vm418_vm0, %v417_v0  ;;  %v63_v3 = vld [vmem:[#allocation2] sm:$0xff]  ;;  %v64_v4 = vld [vmem:[#allocation2 + $0x8] sm:$0xff]  ;;  %vm89_vm1 = vcmask 261120   ;;  %v310_v8 = vld [vmem:[#allocation7 + $0x10] sm:$0xff]   ;;  %vm174_vm2 = vcmask 523264  }
  0x39   :  { %284 = vmatprep.subr.bf16.mxu1 %v417_v0  ;;  %292 = vmatprep.mubr.msk.bf16.mxu1 %vm418_vm0, %v417_v0  ;;  %v308_v5 = vld [vmem:[#allocation7] sm:$0xff]   ;;  %v309_v6 = vld [vmem:[#allocation7 + $0x8] sm:$0xff]   ;;  %v65_v7 = vpack.c.bf16 %v64_v4, %v63_v3  ;;  %v311_v9 = vld [vmem:[#allocation7 + $0x18] sm:$0xff]  }
  0x3a   :  { %277 = vmatpush3.bf16.msra.mxu0 %v306_v1  ;;  %285 = vmatpush3.bf16.msra.mxu1 %v308_v5  ;;  %v249_v10 = vld [vmem:[%s515_s2] ss:$0 sm:$0xff]  ;;  %s419_s2 = smov [#allocation8]  }
  0x3b   :  { %278 = vmatprep.subr.bf16.mxu0 %v417_v0  ;;  %286 = vmatprep.subr.bf16.mxu1 %v417_v0  ;;  %v253_v18 = vld [vmem:[%s517_s4] ss:$0 sm:$0xff]  ;;  %s236_s11 = sshll.u32 %s419_s2, 4  ;;  %s237_s11 = int_to_ptr.vmem [resolvable:$true] %s236_s11 }
  0x3c   :  { %s382_s12 = scalar_lea.vmem %s237_s11, 128  ;;  %p387_p11 = scmp.lt.s32.totalorder %s237_s11, %s237_s11 }
  0x3d   :  { %p383_p10 = scmp.ne.s32.totalorder %s237_s11, %s382_s12  ;;  %p388_p12 = scmp.lt.s32.totalorder %s382_s12, %s382_s12 }
  0x3e   :  { %279 = vmatpush3.bf16.msra.mxu0 %v307_v2  ;;  %287 = vmatpush3.bf16.msra.mxu1 %v309_v6 }
  0x3f   :  { %288 = vmatprep.subr.bf16.mxu1 %v417_v0  ;;  %p389_p13 = por %p388_p12, %p387_p11 }
  0x41   :  { %281 = vmatmul.mubr.msk.bf16.vlgmr.msra.gmra.mrb[0].mxu0 %vm89_vm1, %v65_v7  ;;  %p390_p0 = pnand %p389_p13, %p383_p10 }
  0x42   :  { %289 = vmatpush3.bf16.msra.mxu1 %v310_v8 }
  0x43   :  { %290 = vmatprep.subr.bf16.mxu1 %v417_v0 }
  0x46   :  { %291 = vmatpush3.bf16.msra.mxu1 %v311_v9 }
 0x114   :  { %v127_v11 = vpop.f32.mrb[0].mxu0 }
 0x115   :  { %v282_v12 = vpop.f32.mrb[1].mxu0  ;;  %v128_v14 = vadd.f32 %v249_v10, %v127_v11 }
 0x116   :  { %v130_v13 = vpop.f32.mrb[2].mxu0 }
 0x117   :  { %v131_v15 = vadd.f32 %v249_v10, %v130_v13  ;;  %v283_v16 = vpop.f32.mrb[3].mxu0 }
 0x119   :  { %v134_v17 = vpack.c.bf16 %v131_v15, %v128_v14 }
 0x11b   :  { %293 = vmatmul.mubr.msk.bf16.vlgmr.msra.gmra.mrb[0].mxu1 %vm174_vm2, %v134_v17 }
 0x1ee   :  { %v212_v19 = vpop.f32.mrb[0].mxu1 }
 0x1ef   :  { %v213_v20 = vadd.f32 %v253_v18, %v212_v19  ;;  %v294_v21 = vpop.f32.mrb[1].mxu1 }
 0x1f0   :  { %v215_v22 = vpop.f32.mrb[2].mxu1 }
 0x1f1   :  { %v216_v23 = vadd.f32 %v253_v18, %v215_v22  ;;  %v295_v24 = vpop.f32.mrb[3].mxu1  ;;  %312 = vtanh.f32 %v213_v20 }
 0x1f3   :  { %314 = vtanh.f32 %v216_v23 }
 0x1fb   :  { %v313_v25 = vpop.eup %312 }
 0x1fd   :  { %v315_v26 = vpop.eup %314 }
 0x1fe   :  { %v266_v27 = vpack.c.bf16 %v315_v26, %v313_v25 }
 0x200   :  { %267 = vst [vmem:[#allocation8] sm:$0xff] %v266_v27  }
 0x201   :  { %393 = shalt.err (!%p390_p0)
}
 0x202   :  { %s394_s14 = scalar_lea.hbm %s518_s5, 128 }
 0x203   :  { %p395_p1 = scmp.ne.s32.totalorder %s518_s5, %s394_s14  ;;  %p398_p2 = scmp.lt.u32.totalorder %s394_s14, %s518_s5 }
 0x205   :  { %p400_p3 = pnand %p398_p2, %p395_p1 }
 0x207   :  { %403 = shalt.err (!%p400_p3)
}
 0x208   :  { %242 = dma.vmem_to_hbm [thread:$0]  %s237_s11, 128, %s518_s5, [#allocation4], %s411_s28, %s411_s28, %s412_s29  }
 0x209   :  { %408 = dma.done.wait [#allocation4], 128  }
 0x20a   :  { %409 = vsyncadd [#allocation4], 4294967168 }
 0x20b   :  { %246 = vsyncpa [#allocation3], 1 }
 0x20c   :  { %247 = vsyncpa [#allocation6], 1 }
 0x20d   :  { %248 = vsyncpa [#allocation4], 1 }

</bundles_post_ra>
